<compile_context>
chip_gen: v7x
topology: tpu7x:2x2x1
jax: 0.10.0
libtpu: 0.0.40
codegen_flags: <defaults>
</compile_context>

<pallas_src>
import functools

import jax
import jax.numpy as jnp
from jax.experimental import pallas as pl
from jax.experimental.pallas import tpu as pltpu


def _pick_row_tile(h2, s, c, tw, itemsize, max_block_bytes=2 * 1024 * 1024):
    """Largest multiple-of-8 divisor of h2 whose input block (C, s*th, TW) fits the
    byte budget.  Multiple-of-8 keeps all sublane slices and output blocks (8,128)-dense.
    Falls back to full h2 (block == full array dim is always layout-legal)."""
    cands = [d for d in range(8, h2 + 1, 8) if h2 % d == 0]
    if not cands:
        return h2
    fits = [d for d in cands if c * (s * d) * tw * itemsize <= max_block_bytes]
    return max(fits) if fits else min(cands)


def _col_select(tw, s, dtype):
    """(TW, TW) 0/1 matrix: z[:, s2*(TW//s) + j] = x[:, s*j + s2] via z = x @ col_sel."""
    w2t = tw // s
    i = jnp.arange(tw)[:, None]          # input lane
    k = jnp.arange(tw)[None, :]          # output lane
    return ((i % s) * w2t + i // s == k).astype(dtype)


def _row_select(c, hb, s, dtype):
    """(C, HB, HB) 0/1 matrix (pre-broadcast over C for the batched dot_general):
    u[c, s1*th + t, :] = z[c, s*t + s1, :]."""
    th = hb // s
    r = jnp.arange(hb)[:, None]          # output row
    h = jnp.arange(hb)[None, :]          # input row
    m = ((h % s) * th + h // s == r).astype(dtype)
    return jnp.broadcast_to(m, (c, hb, hb))


def contract_kernel(x_ref, csel_ref, rsel_ref, o_ref, *, gain, compute_dtype, precision):
    # x_ref   : (1, C, s*th, TW)        input rows/cols of this tile
    # csel_ref: (TW, TW)                lane permutation (resident, loaded once)
    # rsel_ref: (C, s*th, s*th)         sublane permutation (resident, loaded once)
    # o_ref   : (1, s*s*C, th, TW//s)
    s = gain
    _, C, HB, TW = x_ref.shape           # HB == s * th
    th = HB // s
    w2t = TW // s

    x = x_ref[0]
    if x_ref.dtype != compute_dtype:     # bf16 inputs: no staging cast
        x = x.astype(compute_dtype)

    # ---- lane (W) de-interleave on the MXU ---------------------------------
    #   z[r, s2*w2t + j] = x[r, s*j + s2]
    z = jnp.dot(x.reshape(C * HB, TW), csel_ref[...],
                precision=precision,
                preferred_element_type=compute_dtype).reshape(C, HB, TW)

    # ---- sublane (H) de-interleave on the MXU (batched over C) -------------
    #   u[c, s1*th + t, :] = z[c, s*t + s1, :]
    u = jax.lax.dot_general(rsel_ref[...], z,
                            dimension_numbers=(((2,), (1,)), ((0,), (0,))),
                            precision=precision,
                            preferred_element_type=compute_dtype)

    # u[c, s1*th + t, s2*w2t + j] == x[c, s*t + s1, s*j + s2]
    # th % 8 == 0 and w2t == 128 (when W is tiled) => every store is (8,128)-dense.
    for s1 in range(s):
        for s2 in range(s):
            g = s1 * s + s2
            o_ref[0, g * C:(g + 1) * C] = (
                u[:, s1 * th:(s1 + 1) * th, s2 * w2t:(s2 + 1) * w2t]
                .astype(o_ref.dtype))


def contract_forward(x, gain=2):
    b, c, h, w = x.shape
    s = int(gain)
    if s == 1:
        return x
    assert h % s == 0 and w % s == 0, "spatial dims must be divisible by gain"
    h2, w2 = h // s, w // s

    # Exactness-preserving compute path per dtype.
    if x.dtype == jnp.bfloat16:
        compute_dtype, precision = jnp.bfloat16, jax.lax.Precision.DEFAULT
    else:
        compute_dtype, precision = jnp.float32, jax.lax.Precision.HIGHEST

    # Lane tile: s*128 keeps the permutation matrix fixed-size and every output
    # group 128-lane aligned; fall back to full W for narrow inputs.
    lane_tile = s * 128
    tw = lane_tile if (w % lane_tile == 0) else w
    w2t = tw // s

    itemsize = x.dtype.itemsize
    th = _pick_row_tile(h2, s, c, tw, itemsize)
    hb = s * th

    csel = _col_select(tw, s, compute_dtype)
    rsel = _row_select(c, hb, s, compute_dtype)

    kernel = functools.partial(contract_kernel, gain=s,
                               compute_dtype=compute_dtype, precision=precision)

    return pl.pallas_call(
        kernel,
        out_shape=jax.ShapeDtypeStruct((b, c * s * s, h2, w2), x.dtype),
        grid=(b, h2 // th, w // tw),
        in_specs=[
            pl.BlockSpec((1, c, hb, tw), lambda n, ht, wt: (n, 0, ht, wt)),
            # Constant block index => DMA'd once, stays VMEM-resident across the grid.
            pl.BlockSpec((tw, tw), lambda n, ht, wt: (0, 0)),
            pl.BlockSpec((c, hb, hb), lambda n, ht, wt: (0, 0, 0)),
        ],
        out_specs=pl.BlockSpec((1, c * s * s, th, w2t),
                               lambda n, ht, wt: (n, 0, ht, wt)),
        compiler_params=pltpu.CompilerParams(
            dimension_semantics=("parallel", "parallel", "parallel"),
            vmem_limit_bytes=32 * 1024 * 1024),
    )(x, csel, rsel)


def contract_reference(x, gain=2):
    b, c, h, w = x.shape
    s = gain
    y = x.reshape(b, c, h // s, s, w // s, s)
    y = jnp.transpose(y, (0, 3, 5, 1, 2, 4))
    return y.reshape(b, c * s * s, h // s, w // s)


if __name__ == "__main__":
    key = jax.random.PRNGKey(0)
    k1, k2, k3 = jax.random.split(key, 3)
    gain = 2

    # 1) Small NCHW batch implied by the module.
    x1 = jax.random.normal(k1, (2, 4, 16, 16), jnp.float32)
    o1 = jax.block_until_ready(contract_forward(x1, gain))
    assert o1.shape == (2, 16, 8, 8)
    assert jnp.allclose(o1, contract_reference(x1, gain), atol=1e-5, rtol=1e-5)

    # 2) Exercises the row-tile (H) grid axis.
    x2 = jax.random.normal(k2, (2, 8, 64, 32), jnp.float32)
    o2 = jax.block_until_ready(contract_forward(x2, gain))
    assert jnp.allclose(o2, contract_reference(x2, gain), atol=1e-5, rtol=1e-5)

    # 3) Exercises the lane (W) tiling path: TW = s*128, two W tiles in the grid.
    x3 = jax.random.normal(k3, (1, 3, 16, 512), jnp.float32)
    o3 = jax.block_until_ready(contract_forward(x3, gain))
    assert jnp.allclose(o3, contract_reference(x3, gain), atol=1e-5, rtol=1e-5)

    # 4) bf16 fast path (no f32 staging; 0/1 selection matmuls are exact in bf16).
    x4 = x2.astype(jnp.bfloat16)
    o4 = jax.block_until_ready(contract_forward(x4, gain))
    assert o4.dtype == jnp.bfloat16
    assert jnp.allclose(o4.astype(jnp.float32),
                        contract_reference(x4, gain).astype(jnp.float32),
                        atol=1e-2, rtol=1e-2)

    print("KERNEL_OK")
</pallas_src>

<mosaic_0001>
module attributes {stable_mosaic.version = 11 : i64} {
  func.func @contract_kernel(%arg0: i32, %arg1: i32, %arg2: i32, %arg3: memref<1x4x16x16xf32, #tpu.memory_space<vmem>>, %arg4: memref<16x16xf32, #tpu.memory_space<vmem>>, %arg5: memref<4x16x16xf32, #tpu.memory_space<vmem>>, %arg6: memref<1x16x8x8xf32, #tpu.memory_space<vmem>>) attributes {dimension_semantics = [#tpu.dimension_semantics<parallel>, #tpu.dimension_semantics<parallel>, #tpu.dimension_semantics<parallel>], iteration_bounds = array<i64: 2, 1, 1>, scalar_prefetch = 0 : i64, scratch_operands = 0 : i64, tpu.core_type = #tpu.core_type<tc>, window_params = [{transform_indices = @transform_0, window_bounds = array<i64: 1, 4, 16, 16>}, {pipeline_mode = #tpu.pipeline_mode<synchronous>, transform_indices = @transform_1, window_bounds = array<i64: 16, 16>}, {pipeline_mode = #tpu.pipeline_mode<synchronous>, transform_indices = @transform_2, window_bounds = array<i64: 4, 16, 16>}, {transform_indices = @transform_3, window_bounds = array<i64: 1, 16, 8, 8>}]} {
    %c0 = arith.constant 0 : index
    %c0_0 = arith.constant 0 : index
    %c0_1 = arith.constant 0 : index
    %c0_2 = arith.constant 0 : index
    %0 = vector.load %arg3[%c0, %c0_0, %c0_1, %c0_2] : memref<1x4x16x16xf32, #tpu.memory_space<vmem>>, vector<1x4x16x16xf32>
    %1 = vector.shape_cast %0 : vector<1x4x16x16xf32> to vector<4x16x16xf32>
    %2 = vector.shape_cast %1 : vector<4x16x16xf32> to vector<64x16xf32>
    %c0_3 = arith.constant 0 : index
    %c0_4 = arith.constant 0 : index
    %3 = vector.load %arg4[%c0_3, %c0_4] : memref<16x16xf32, #tpu.memory_space<vmem>>, vector<16x16xf32>
    %cst = arith.constant dense<0.000000e+00> : vector<64x16xf32>
    %4 = tpu.matmul %2, %3, %cst {dimension_numbers = #tpu.dot_dimension_numbers<[1], [0], [0], [1], [0, 0, 1, 1], [], []>, precision = #tpu.contract_precision<fp32>} : vector<64x16xf32>, vector<16x16xf32>, vector<64x16xf32> -> vector<64x16xf32>
    %5 = vector.shape_cast %4 : vector<64x16xf32> to vector<4x16x16xf32>
    %c0_5 = arith.constant 0 : index
    %c0_6 = arith.constant 0 : index
    %c0_7 = arith.constant 0 : index
    %6 = vector.load %arg5[%c0_5, %c0_6, %c0_7] : memref<4x16x16xf32, #tpu.memory_space<vmem>>, vector<4x16x16xf32>
    %cst_8 = arith.constant dense<0.000000e+00> : vector<4x16x16xf32>
    %7 = tpu.matmul %6, %5, %cst_8 {dimension_numbers = #tpu.dot_dimension_numbers<[2], [1], [1], [2], [0, 0, 0, 1, 1, 2], [0], [0]>, precision = #tpu.contract_precision<fp32>} : vector<4x16x16xf32>, vector<4x16x16xf32>, vector<4x16x16xf32> -> vector<4x16x16xf32>
    %8 = vector.extract_strided_slice %7 {offsets = [0, 0, 0], sizes = [4, 8, 8], strides = [1, 1, 1]} : vector<4x16x16xf32> to vector<4x8x8xf32>
    %c0_9 = arith.constant 0 : index
    %c0_10 = arith.constant 0 : index
    %c0_11 = arith.constant 0 : index
    %c0_12 = arith.constant 0 : index
    %9 = vector.load %arg6[%c0_9, %c0_10, %c0_11, %c0_12] : memref<1x16x8x8xf32, #tpu.memory_space<vmem>>, vector<1x4x8x8xf32>
    %10 = vector.shape_cast %9 : vector<1x4x8x8xf32> to vector<4x8x8xf32>
    %11 = vector.shape_cast %8 : vector<4x8x8xf32> to vector<1x4x8x8xf32>
    tpu.vector_store %arg6[%c0_9, %c0_10, %c0_11, %c0_12], %11 {strides = array<i32>} : memref<1x16x8x8xf32, #tpu.memory_space<vmem>>, vector<1x4x8x8xf32>,
    %12 = vector.extract_strided_slice %7 {offsets = [0, 0, 8], sizes = [4, 8, 8], strides = [1, 1, 1]} : vector<4x16x16xf32> to vector<4x8x8xf32>
    %c0_13 = arith.constant 0 : index
    %c4 = arith.constant 4 : index
    %c0_14 = arith.constant 0 : index
    %c0_15 = arith.constant 0 : index
    %13 = vector.load %arg6[%c0_13, %c4, %c0_14, %c0_15] : memref<1x16x8x8xf32, #tpu.memory_space<vmem>>, vector<1x4x8x8xf32>
    %14 = vector.shape_cast %13 : vector<1x4x8x8xf32> to vector<4x8x8xf32>
    %15 = vector.shape_cast %12 : vector<4x8x8xf32> to vector<1x4x8x8xf32>
    tpu.vector_store %arg6[%c0_13, %c4, %c0_14, %c0_15], %15 {strides = array<i32>} : memref<1x16x8x8xf32, #tpu.memory_space<vmem>>, vector<1x4x8x8xf32>,
    %16 = vector.extract_strided_slice %7 {offsets = [0, 8, 0], sizes = [4, 8, 8], strides = [1, 1, 1]} : vector<4x16x16xf32> to vector<4x8x8xf32>
    %c0_16 = arith.constant 0 : index
    %c8 = arith.constant 8 : index
    %c0_17 = arith.constant 0 : index
    %c0_18 = arith.constant 0 : index
    %17 = vector.load %arg6[%c0_16, %c8, %c0_17, %c0_18] : memref<1x16x8x8xf32, #tpu.memory_space<vmem>>, vector<1x4x8x8xf32>
    %18 = vector.shape_cast %17 : vector<1x4x8x8xf32> to vector<4x8x8xf32>
    %19 = vector.shape_cast %16 : vector<4x8x8xf32> to vector<1x4x8x8xf32>
    tpu.vector_store %arg6[%c0_16, %c8, %c0_17, %c0_18], %19 {strides = array<i32>} : memref<1x16x8x8xf32, #tpu.memory_space<vmem>>, vector<1x4x8x8xf32>,
    %20 = vector.extract_strided_slice %7 {offsets = [0, 8, 8], sizes = [4, 8, 8], strides = [1, 1, 1]} : vector<4x16x16xf32> to vector<4x8x8xf32>
    %c0_19 = arith.constant 0 : index
    %c12 = arith.constant 12 : index
    %c0_20 = arith.constant 0 : index
    %c0_21 = arith.constant 0 : index
    %21 = vector.load %arg6[%c0_19, %c12, %c0_20, %c0_21] : memref<1x16x8x8xf32, #tpu.memory_space<vmem>>, vector<1x4x8x8xf32>
    %22 = vector.shape_cast %21 : vector<1x4x8x8xf32> to vector<4x8x8xf32>
    %23 = vector.shape_cast %20 : vector<4x8x8xf32> to vector<1x4x8x8xf32>
    tpu.vector_store %arg6[%c0_19, %c12, %c0_20, %c0_21], %23 {strides = array<i32>} : memref<1x16x8x8xf32, #tpu.memory_space<vmem>>, vector<1x4x8x8xf32>,
    return
  }
  func.func @transform_0(%arg0: i32, %arg1: i32, %arg2: i32) -> (i32, i32, i32, i32) {
    %c0_i32 = arith.constant 0 : i32
    %c0_i32_0 = arith.constant 0 : i32
    return %arg0, %c0_i32, %arg1, %arg2 : i32, i32, i32, i32
  }
  func.func @transform_1(%arg0: i32, %arg1: i32, %arg2: i32) -> (i32, i32) {
    %c0_i32 = arith.constant 0 : i32
    %c0_i32_0 = arith.constant 0 : i32
    %c0_i32_1 = arith.constant 0 : i32
    return %c0_i32, %c0_i32_0 : i32, i32
  }
  func.func @transform_2(%arg0: i32, %arg1: i32, %arg2: i32) -> (i32, i32, i32) {
    %c0_i32 = arith.constant 0 : i32
    %c0_i32_0 = arith.constant 0 : i32
    %c0_i32_1 = arith.constant 0 : i32
    %c0_i32_2 = arith.constant 0 : i32
    return %c0_i32, %c0_i32_0, %c0_i32_1 : i32, i32, i32
  }
  func.func @transform_3(%arg0: i32, %arg1: i32, %arg2: i32) -> (i32, i32, i32, i32) {
    %c0_i32 = arith.constant 0 : i32
    %c0_i32_0 = arith.constant 0 : i32
    return %arg0, %c0_i32, %arg1, %arg2 : i32, i32, i32, i32
  }
}

</mosaic_0001>

<bundles_post_ra>
// kernel: tpu_custom_call.1
= control target key start
LH: loop header
LB: loop body
LE: loop exit
PB: predicated region body
PF: predicated region fallthrough
CT: control target
= control target key end

     0   :  { %8 = vsyncpa [#allocation3], 0  ;;  %s4652_s0 = inlined_call_operand.hbm [shape: f32[2,4,16,16], index: 0, kind: input, shape index: {}]   ;;  %s4653_s1 = inlined_call_operand.hbm [shape: f32[16,16], index: 1, kind: input, shape index: {}]   ;;  %s4654_s2 = inlined_call_operand.hbm [shape: f32[4,16,16], index: 2, kind: input, shape index: {}]   ;;  %s4655_s3 = inlined_call_operand.vmem [shape: f32[2,16,8,8], index: 3, kind: output, shape index: {}]  }
   0x1   :  { %10 = vsyncpa [#allocation3 + $0x1], 0 }
   0x2   :  { %11 = vsyncpa [#allocation5], 0  ;;  %s4173_s12 = smov 0   ;;  %s4175_s13 = smov 0  }
   0x3   :  { %s4177_s14 = smov 0   ;;  %s4179_s15 = smov 0  }
   0x4   :  { %s4181_s16 = smov 0   ;;  %s4183_s17 = smov 0  }
   0x5 LB: > { %s3275_s18 = sadd.s32 4294967295, %s4145_s17   ;;  %p60_p0 = scmp.ne.s32.totalorder %s4129_s13, %s4125_s12  ;;  %s4145_s17 = sphi %s4183_s17, %s17_s17   ;;  %s4141_s16 = sphi %s4181_s16, %s4673_s16   ;;  %s4137_s15 = sphi %s4179_s15, %s4672_s15   ;;  %s4133_s14 = sphi %s4177_s14, %s4671_s14   ;;  %s4129_s13 = sphi %s4175_s13, %s4670_s13   ;;  %s4125_s12 = sphi %s4173_s12, %s4669_s12  }
   0x6   : > { %p4203_p1 = scmp.eq.s32.totalorder %s3275_s18, 0  ;;  %p3277_p2 = scmp.ge.s32.totalorder %s4145_s17, 1 }
   0x7   : > { %p143_p3 = scmp.lt.s32.totalorder %s4145_s17, 3  ;;  %s4147_s22 = smov [#allocation4]  }
   0x8   : > { %s4660_s19 = scalar_select %p4203_p1, 1, 0 }
   0x9   : > { %p4211_p4 = por %p4203_p1, %p60_p0  ;;  %p4215_p5 = pnand %p3277_p2, %p143_p3 }
   0xa   : > { %s155_s23 = sshll.u32 %s4147_s22, 4  ;;  %s4148_s25 = smov [#allocation6]   ;;  %s156_s23 = int_to_ptr.vmem [resolvable:$true] %s155_s23 }
   0xb   : > { %s4661_s20 = scalar_select %p4211_p4, 1, 0 }
   0xc   : > { %s4662_s21 = scalar_select %p4215_p5, 1, 0 }
   0xd   : > { %p3936_p6 = pneg %p4215_p5  ;;  %s168_s26 = sshll.u32 %s4148_s25, 4  ;;  %s4227_s26 = int_to_ptr.vmem [resolvable:$true] %s168_s26 }
   0xe   : > { %s4005_s29 = scalar_lea.hbm %s4653_s1, 256 }
   0xf   : > { %p4223_p7 = pnand %p3936_p6, %p4203_p1  ;;  %p4006_p8 = scmp.ne.s32.totalorder %s4653_s1, %s4005_s29 }
  0x10   : > { %p4012_p12 = scmp.lt.u32.totalorder %s4005_s29, %s4653_s1 }
  0x11   : > { %p4007_p9 = pneg %p4223_p7 }
  0x13   : > { %p4008_p10 = pnand %p4007_p9, %p4006_p8 }
  0x15   : > { %p4009_p11 = pneg %p4008_p10 }
  0x17   : > { %p4014_p13 = pnand %p4012_p12, %p4009_p11 }
  0x19   : > { %4017 = shalt.err (!%p4014_p13)
}
  0x1a   : > { %s4018_s7 = scalar_lea.vmem %s156_s23, 256  ;;  %p4026_p6 = scmp.lt.s32.totalorder %s156_s23, %s156_s23 }
  0x1b   : > { %p4019_p0 = scmp.ne.s32.totalorder %s156_s23, %s4018_s7  ;;  %p4027_p1 = scmp.lt.s32.totalorder %s4018_s7, %s4018_s7 }
  0x1d   : > { %p4021_p2 = pnand %p4019_p0, %p4007_p9  ;;  %p4028_p4 = por %p4027_p1, %p4026_p6 }
  0x1f   : > { %p4022_p3 = pneg %p4021_p2 }
  0x21   : > { %p4029_p5 = pnand %p4028_p4, %p4022_p3 }
  0x23   : > { %4032 = shalt.err (!%p4029_p5)
}
  0x24   : > { %s4149_s8 = smov 128   ;;  %s4150_s9 = smov 8  }
  0x25   : > { %3939 = dma.hbm_to_vmem [thread:$0]  (!%p4223_p7), %s4653_s1, 256, %s156_s23, [#allocation5], %s4149_s8, %s4149_s8, %s4150_s9  }
  0x26   : > { %s4033_s22 = scalar_lea.hbm %s4654_s2, 1024 }
  0x27   : > { %p4034_p1 = scmp.ne.s32.totalorder %s4654_s2, %s4033_s22  ;;  %p4040_p8 = scmp.lt.u32.totalorder %s4033_s22, %s4654_s2 }
  0x29   : > { %p4036_p4 = pnand %p4034_p1, %p4007_p9 }
  0x2b   : > { %p4037_p5 = pneg %p4036_p4 }
  0x2d   : > { %p4042_p10 = pnand %p4040_p8, %p4037_p5 }
  0x2f   : > { %4045 = shalt.err (!%p4042_p10)
}
  0x30   : > { %s4046_s23 = scalar_lea.vmem %s4227_s26, 1024  ;;  %p4054_p0 = scmp.lt.s32.totalorder %s4227_s26, %s4227_s26 }
  0x31   : > { %p4047_p11 = scmp.ne.s32.totalorder %s4227_s26, %s4046_s23  ;;  %p4055_p2 = scmp.lt.s32.totalorder %s4046_s23, %s4046_s23 }
  0x33   : > { %p4049_p12 = pnand %p4047_p11, %p4007_p9  ;;  %p4056_p3 = por %p4055_p2, %p4054_p0 }
  0x35   : > { %p4050_p13 = pneg %p4049_p12 }
  0x37   : > { %p4057_p6 = pnand %p4056_p3, %p4050_p13 }
  0x39   : > { %4060 = shalt.err (!%p4057_p6)
}
  0x3a   : > { %3942 = dma.hbm_to_vmem [thread:$0]  (!%p4223_p7), %s4654_s2, 1024, %s4227_s26, [#allocation5], %s4149_s8, %s4149_s8, %s4150_s9  }
  0x3b   : > { %s36_s5 = sadd.s32 1, %s4141_s16  ;;  %s47_s24 = sadd.s32 1, %s4133_s14 }
  0x3c   : > { %p38_p9 = scmp.ge.s32.totalorder %s36_s5, 2  ;;  %p54_p1 = scmp.ne.s32.totalorder %s4133_s14, %s4129_s13 }
  0x3d   : > { %p55_p4 = scmp.eq.s32.totalorder %s4145_s17, 0  ;;  %p3949_p5 = scmp.lt.s32.totalorder %s4145_s17, 2 }
  0x3e   : > { %s4675_s5 = smov (%p38_p9, %s36_s5), 0  ;;  %s182_s6 = sand.u32 1, %s4133_s14  }
  0x3f   : > { %p56_p8 = por %p55_p4, %p54_p1  ;;  %s40_s7 = ssub.s32 %s4141_s16, %s4675_s5 }
  0x40   : > { %p45_p10 = scmp.eq.s32.totalorder %s40_s7, 0  ;;  %s3281_s10 = sshll.u32 %s182_s6, 6 }
  0x41   : > { %s3304_s11 = sshll.u32 %s4141_s16, 10  ;;  %s186_s25 = scalar_lea.vmem [#allocation2], %s3281_s10 }
  0x42   : > { %s4295_s12 = scalar_select %p45_p10, %s4133_s14, %s47_s24  }
  0x43   : > { %s4300_s22 = scalar_lea.hbm %s4652_s0, %s3304_s11  ;;  %s196_s27 = sshll.u32 %s186_s25, 4  ;;  %s4302_s27 = int_to_ptr.vmem [resolvable:$true] %s196_s27 }
  0x44   : > { %p4306_p7 = pnand %p3949_p5, %p56_p8  ;;  %s4310_s29 = scalar_lea.sflag [#allocation3], %s182_s6 }
  0x45   : > { %s4061_s23 = scalar_lea.hbm %s4300_s22, 1024  ;;  %s4066_s24 = scalar_lea.hbm %s4652_s0, 2048 }
  0x46   : > { %p4062_p11 = scmp.ne.s32.totalorder %s4300_s22, %s4061_s23  ;;  %p4063_p12 = pneg %p4306_p7 }
  0x47   : > { %p4067_p2 = scmp.lt.u32.totalorder %s4300_s22, %s4652_s0  ;;  %p4068_p3 = scmp.lt.u32.totalorder %s4066_s24, %s4061_s23 }
  0x48   : > { %p4064_p13 = pnand %p4063_p12, %p4062_p11  ;;  %p4070_p9 = scmp.lt.u32.totalorder %s4061_s23, %s4300_s22 }
  0x49   : > { %p4069_p6 = por %p4068_p3, %p4067_p2 }
  0x4a   : > { %p4065_p0 = pneg %p4064_p13 }
  0x4b   : > { %p4071_p1 = por %p4070_p9, %p4069_p6 }
  0x4d   : > { %p4072_p4 = pnand %p4071_p1, %p4065_p0 }
  0x4f   : > { %4075 = shalt.err (!%p4072_p4)
}
  0x50   : > { %s4076_s6 = scalar_lea.vmem %s4302_s27, 1024  ;;  %s4151_s11 = smov [#allocation2]  }
  0x51   : > { %p4077_p5 = scmp.ne.s32.totalorder %s4302_s27, %s4076_s6  ;;  %s4081_s18 = sshll.u32 %s4151_s11, 4  ;;  %s4082_s18 = int_to_ptr.vmem [resolvable:$false] %s4081_s18 }
  0x52   : > { %s4083_s26 = scalar_lea.vmem %s4082_s18, 2048  ;;  %p4084_p11 = scmp.lt.s32.totalorder %s4302_s27, %s4082_s18 }
  0x53   : > { %p4079_p8 = pnand %p4077_p5, %p4063_p12  ;;  %p4085_p13 = scmp.lt.s32.totalorder %s4083_s26, %s4076_s6 }
  0x55   : > { %p4080_p10 = pneg %p4079_p8  ;;  %p4086_p2 = por %p4085_p13, %p4084_p11 }
  0x57   : > { %p4087_p3 = pnand %p4086_p2, %p4080_p10 }
  0x59   : > { %4090 = shalt.err (!%p4087_p3)
}
  0x5a   : > { %3946 = dma.hbm_to_vmem [thread:$0]  (!%p4306_p7), %s4300_s22, 1024, %s4302_s27, %s4310_s29, %s4149_s8, %s4149_s8, %s4150_s9  }
  0x5b   : > { %p4665_p12 = scmp.ne.s32.totalorder %s4662_s21, 0 }
  0x5c   : > { %s210_s25 = sand.u32 (!%p4665_p12), 1, %s4129_s13   ;;  %p4666_p0 = scmp.ne.s32.totalorder (!%p4665_p12), %s4661_s20, 0 }
  0x5d   : > { %208 = sbr.rel (%p4665_p12) target bundleno = 924 (0x39c), region = 32  ;;  %s3285_s23 = sshll.u32 (!%p4665_p12), %s210_s25, 6 }
  0x5e   : > { %s211_s30 = scalar_lea.sflag (!%p4665_p12), [#allocation3], %s210_s25  ;;  %s4344_s4 = scalar_lea.vmem (!%p4665_p12), [#allocation2], %s3285_s23 }
  0x64   : > { %4116 = dma.done.wait (%p4666_p0), %s211_s30, 1024  }
  0x65   : > { %4118 = vsyncadd (%p4666_p0), %s211_s30, 4294966272  ;;  %p4667_p6 = scmp.ne.s32.totalorder %s4660_s19, 0 }
  0x67   : > { %4120 = dma.done.wait (%p4667_p6), [#allocation5], 1280  }
  0x68   : > { %4122 = vsyncadd (%p4667_p6), [#allocation5], 4294966016  ;;  %vm273_vm0 = vcmask 130048   ;;  %v271_v0 = vld [vmem:[#allocation4] sm:$0xff]  ;;  %v272_v1 = vld [vmem:[#allocation4 + $0x8] sm:$0xff]  ;;  %p252_p7 = scmp.lt.s32.totalorder %s4137_s15, 1 }
  0x69   : > { %v263_v2 = vld [vmem:[%s4344_s4] sm:$0xff]  ;;  %v299_v3 = vand.u32 4294901760, %v271_v0  ;;  %v302_v4 = vand.u32 4294901760, %v272_v1  ;;  %v264_v6 = vld [vmem:[%s4344_s4 + $0x8] sm:$0xff]  ;;  %v265_v7 = vld [vmem:[%s4344_s4 + $0x10] sm:$0xff]  ;;  %vm3098_vm1 = vcmask 64512  }
  0x6a   : > { %v275_v5 = vsel %vm273_vm0, %v263_v2, 0  ;;  %v266_v8 = vld [vmem:[%s4344_s4 + $0x18] sm:$0xff]  ;;  %v278_v10 = vsel %vm273_vm0, %v264_v6, 0  ;;  %v281_v11 = vsel %vm273_vm0, %v265_v7, 0  ;;  %v267_v13 = vld [vmem:[%s4344_s4 + $0x20] sm:$0xff]  ;;  %v268_v18 = vld [vmem:[%s4344_s4 + $0x28] sm:$0xff] }
  0x6b   : > { %v4359_v9 = vand.u32 4294901760, %v275_v5  ;;  %v284_v12 = vsel %vm273_vm0, %v266_v8, 0  ;;  %v4365_v14 = vpack.c.bf16 %v302_v4, %v299_v3  ;;  %v4367_v15 = vand.u32 4294901760, %v278_v10  ;;  %v269_v43 = vld [vmem:[%s4344_s4 + $0x30] sm:$0xff]  ;;  %v270_v44 = vld [vmem:[%s4344_s4 + $0x38] sm:$0xff]  ;;  %s4677_s15 = smov (!%p252_p7, %s4137_s15), 1 }
  0x6c   : > { %v4369_v16 = vand.u32 4294901760, %v281_v11  ;;  %v4371_v17 = vand.u32 4294901760, %v284_v12  ;;  %v4377_v20 = vsub.f32 %v271_v0, %v299_v3  ;;  %v4379_v21 = vsub.f32 %v272_v1, %v302_v4  ;;  %v1058_v8 = vld [vmem:[#allocation6] sm:$0xff]  ;;  %s3305_s19 = sshll.u32 %s4677_s15, 7  ;;  %s4152_s9 = smov 120  }
  0x6d   : > { %v4375_v19 = vsub.f32 %v275_v5, %v4359_v9  ;;  %v287_v22 = vsel %vm273_vm0, %v267_v13, 0  ;;  %3727 = vmatprep.subr.bf16.mxu0 %v4365_v14  ;;  %v4384_v23 = vsub.f32 %v278_v10, %v4367_v15  ;;  %v290_v30 = vsel %vm273_vm0, %v268_v18, 0  ;;  %s4600_s8 = scalar_lea.vmem %s4655_s3, %s3305_s19 }
  0x6e   : > { %v4387_v24 = vsub.f32 %v281_v11, %v4369_v16  ;;  %v4390_v25 = vsub.f32 %v284_v12, %v4371_v17  ;;  %v4392_v26 = vand.u32 4294901760, %v287_v22  ;;  %3729 = vmatpush3.bf16.msra.mxu0 %v4365_v14  ;;  %v448_v28 = vand.u32 4294901760, %v4377_v20 }
  0x6f   : > { %v367_v27 = vand.u32 4294901760, %v4375_v19  ;;  %v455_v29 = vand.u32 4294901760, %v4379_v21  ;;  %v377_v31 = vand.u32 4294901760, %v4384_v23  ;;  %v4414_v38 = vand.u32 4294901760, %v290_v30 }
  0x70   : > { %v387_v32 = vand.u32 4294901760, %v4387_v24  ;;  %v397_v33 = vand.u32 4294901760, %v4390_v25  ;;  %v4403_v34 = vsub.f32 %v287_v22, %v4392_v26  ;;  %v449_v36 = vsub.f32 %v4377_v20, %v448_v28 }
  0x71   : > { %v368_v35 = vsub.f32 %v4375_v19, %v367_v27  ;;  %v456_v37 = vsub.f32 %v4379_v21, %v455_v29  ;;  %v378_v39 = vsub.f32 %v4384_v23, %v377_v31  ;;  %v416_v48 = vsub.f32 %v290_v30, %v4414_v38 }
  0x72   : > { %v388_v40 = vsub.f32 %v4387_v24, %v387_v32  ;;  %v398_v41 = vsub.f32 %v4390_v25, %v397_v33  ;;  %v407_v42 = vand.u32 4294901760, %v4403_v34  ;;  %v450_v46 = vand.u32 4294901760, %v449_v36 }
  0x73   : > { %v369_v45 = vand.u32 4294901760, %v368_v35  ;;  %v457_v47 = vand.u32 4294901760, %v456_v37  ;;  %v379_v49 = vand.u32 4294901760, %v378_v39  ;;  %v417_v53 = vand.u32 4294901760, %v416_v48 }
  0x74   : > { %v389_v50 = vand.u32 4294901760, %v388_v40  ;;  %v408_v51 = vsub.f32 %v4403_v34, %v407_v42  ;;  %v293_v54 = vsel %vm273_vm0, %v269_v43, 0  ;;  %v296_v55 = vsel %vm273_vm0, %v270_v44, 0 }
  0x75   : > { %3466 = vmatprep.mubr.f32.mxu0 %v369_v45  ;;  %v3730_v52 = vpack.c.bf16 %v457_v47, %v450_v46  ;;  %v399_v56 = vand.u32 4294901760, %v398_v41  ;;  %v4434_v57 = vand.u32 4294901760, %v293_v54  ;;  %v4436_v58 = vand.u32 4294901760, %v296_v55 }
  0x76   : > { %3467 = vmatmul.mubr.f32.vlgmr.msra.gmra.mrb[0].mxu0 %v379_v49  ;;  %v3734_v59 = vpack.c.bf16 %v4379_v21, %v4377_v20  ;;  %v409_v60 = vand.u32 4294901760, %v408_v51  ;;  %v418_v61 = vsub.f32 %v416_v48, %v417_v53  ;;  %v3742_v7 = vpack.c.bf16 %v455_v29, %v448_v28 }
  0x77   : > { %3469 = vmatprep.mubr.f32.mxu0 %v389_v50  ;;  %3731 = vmatprep.subr.bf16.mxu0 %v3730_v52  ;;  %v426_v62 = vsub.f32 %v293_v54, %v4434_v57  ;;  %v436_v63 = vsub.f32 %v296_v55, %v4436_v58  ;;  %v1067_v10 = vsel %vm273_vm0, %v1058_v8, 0 }
  0x78   : > { %3733 = vmatpush3.bf16.msra.mxu0 %v3730_v52  ;;  %v419_v0 = vand.u32 4294901760, %v418_v61  ;;  %v4490_v11 = vand.u32 4294901760, %v1067_v10 }
  0x79   : > { %3735 = vmatprep.subr.bf16.mxu0 %v3734_v59  ;;  %v427_v1 = vand.u32 4294901760, %v426_v62  ;;  %v437_v2 = vand.u32 4294901760, %v436_v63 }
  0x7a   : > { %3470 = vmatmul.mubr.f32.gmra.mrb[2].mxu0 %v399_v56 }
  0x7b   : > { %3472 = vmatprep.mubr.f32.mxu0 %v409_v60  ;;  %v428_v3 = vsub.f32 %v426_v62, %v427_v1  ;;  %v438_v4 = vsub.f32 %v436_v63, %v437_v2 }
  0x7d   : > { %v429_v5 = vand.u32 4294901760, %v428_v3  ;;  %v439_v6 = vand.u32 4294901760, %v438_v4 }
  0x7e   : > { %3473 = vmatmul.mubr.f32.gmra.mrb[4].mxu0 %v419_v0 }
  0x7f   : > { %3475 = vmatprep.mubr.f32.mxu0 %v429_v5 }
  0x82   : > { %3476 = vmatmul.mubr.f32.gmra.mrb[6].mxu0 %v439_v6 }
  0x83   : > { %3482 = vmatprep.mubr.f32.mxu0 %v4359_v9 }
  0x86   : > { %3483 = vmatmul.mubr.f32.vlgmr.msra.gmra.mrb[0].mxu0 %v4367_v15 }
  0x87   : > { %3485 = vmatprep.mubr.f32.mxu0 %v4369_v16  ;;  %3737 = vmatpush3.bf16.msra.mxu0 %v3734_v59 }
  0x88   : > { %3739 = vmatprep.subr.bf16.mxu0 %v4365_v14 }
  0x8a   : > { %3486 = vmatmul.mubr.f32.gmra.mrb[2].mxu0 %v4371_v17 }
  0x8b   : > { %3488 = vmatprep.mubr.f32.mxu0 %v4392_v26 }
  0x8e   : > { %3489 = vmatmul.mubr.f32.gmra.mrb[4].mxu0 %v4414_v38 }
  0x8f   : > { %3491 = vmatprep.mubr.f32.mxu0 %v4434_v57 }
  0x92   : > { %3492 = vmatmul.mubr.f32.gmra.mrb[6].mxu0 %v4436_v58 }
  0x93   : > { %3498 = vmatprep.mubr.f32.mxu0 %v4375_v19 }
  0x96   : > { %3499 = vmatmul.mubr.f32.vlgmr.msra.gmra.mrb[0].mxu0 %v4384_v23 }
  0x97   : > { %3501 = vmatprep.mubr.f32.mxu0 %v4387_v24  ;;  %3741 = vmatpush3.bf16.msra.mxu0 %v4365_v14 }
  0x98   : > { %3743 = vmatprep.subr.bf16.mxu0 %v3742_v7 }
  0x9a   : > { %3502 = vmatmul.mubr.f32.gmra.mrb[2].mxu0 %v4390_v25 }
  0x9b   : > { %3504 = vmatprep.mubr.f32.mxu0 %v4403_v34 }
  0x9e   : > { %3505 = vmatmul.mubr.f32.gmra.mrb[4].mxu0 %v416_v48 }
  0x9f   : > { %3507 = vmatprep.mubr.f32.mxu0 %v426_v62 }
  0xa2   : > { %3508 = vmatmul.mubr.f32.gmra.mrb[6].mxu0 %v436_v63 }
  0xa3   : > { %3514 = vmatprep.mubr.f32.mxu0 %v367_v27 }
  0xa6   : > { %3515 = vmatmul.mubr.f32.vlgmr.msra.gmra.mrb[0].mxu0 %v377_v31 }
  0xa7   : > { %3517 = vmatprep.mubr.f32.mxu0 %v387_v32  ;;  %3745 = vmatpush3.bf16.msra.mxu0 %v3742_v7 }
  0xa8   : > { %3747 = vmatprep.subr.bf16.mxu0 %v4365_v14 }
  0xaa   : > { %3518 = vmatmul.mubr.f32.gmra.mrb[2].mxu0 %v397_v33 }
  0xab   : > { %3520 = vmatprep.mubr.f32.mxu0 %v407_v42 }
  0xae   : > { %3521 = vmatmul.mubr.f32.gmra.mrb[4].mxu0 %v417_v53 }
  0xaf   : > { %3523 = vmatprep.mubr.f32.mxu0 %v427_v1 }
  0xb2   : > { %3524 = vmatmul.mubr.f32.gmra.mrb[6].mxu0 %v437_v2 }
  0xb3   : > { %3530 = vmatprep.mubr.f32.mxu0 %v4359_v9 }
  0xb6   : > { %3531 = vmatmul.mubr.f32.vlgmr.msra.gmra.mrb[0].mxu0 %v4367_v15 }
  0xb7   : > { %3533 = vmatprep.mubr.f32.mxu0 %v4369_v16  ;;  %3749 = vmatpush3.bf16.msra.mxu0 %v4365_v14 }
  0xba   : > { %3534 = vmatmul.mubr.f32.gmra.mrb[2].mxu0 %v4371_v17 }
  0xbb   : > { %3536 = vmatprep.mubr.f32.mxu0 %v4392_v26 }
  0xbe   : > { %3537 = vmatmul.mubr.f32.gmra.mrb[4].mxu0 %v4414_v38 }
  0xbf   : > { %3539 = vmatprep.mubr.f32.mxu0 %v4434_v57 }
  0xc2   : > { %3540 = vmatmul.mubr.f32.gmra.mrb[6].mxu0 %v4436_v58 }
  0xc3   : > { %3546 = vmatprep.mubr.f32.mxu0 %v4359_v9  ;;  %v4493_v9 = vsub.f32 %v1067_v10, %v4490_v11 }
  0xc5   : > { %v1141_v12 = vand.u32 4294901760, %v4493_v9 }
  0xc6   : > { %3547 = vmatmul.mubr.f32.vlgmr.msra.gmra.mrb[0].mxu0 %v4367_v15  ;;  %v1059_v15 = vld [vmem:[#allocation6 + $0x8] sm:$0xff] }
  0xc7   : > { %3549 = vmatprep.mubr.f32.mxu0 %v4369_v16  ;;  %v1142_v13 = vsub.f32 %v4493_v9, %v1141_v12  ;;  %v1070_v16 = vsel %vm273_vm0, %v1059_v15, 0 }
  0xc9   : > { %v1143_v14 = vand.u32 4294901760, %v1142_v13 }
  0xca   : > { %3550 = vmatmul.mubr.f32.gmra.mrb[2].mxu0 %v4371_v17  ;;  %v4500_v17 = vand.u32 4294901760, %v1070_v16 }
  0xcb   : > { %3552 = vmatprep.mubr.f32.mxu0 %v4392_v26  ;;  %3562 = vmatprep.mubr.f32.mxu1 %v1143_v14 }
  0xcc   : > { %v4503_v18 = vsub.f32 %v1070_v16, %v4500_v17 }
  0xce   : > { %3553 = vmatmul.mubr.f32.gmra.mrb[4].mxu0 %v4414_v38  ;;  %v1151_v19 = vand.u32 4294901760, %v4503_v18 }
  0xcf   : > { %3555 = vmatprep.mubr.f32.mxu0 %v4434_v57 }
  0xd0   : > { %v1152_v24 = vsub.f32 %v4503_v18, %v1151_v19 }
  0xd2   : > { %3556 = vmatmul.mubr.f32.gmra.mrb[6].mxu0 %v4436_v58  ;;  %v1153_v34 = vand.u32 4294901760, %v1152_v24 }
 0x199   : > { %v3548_v20 = vpop.f32.mrb[0].mxu0 }
 0x19a   : > { %v1076_v21 = vand.u32 4294901760, %v3548_v20  ;;  %v1012_v22 = vpop.f32.mrb[1].mxu0 }
 0x19b   : > { %v1073_v23 = vand.u32 4294901760, %v1012_v22 }
 0x19c   : > { %v1168_v25 = vsub.f32 %v3548_v20, %v1076_v21 }
 0x19d   : > { %v4509_v26 = vpack.c.bf16 %v1076_v21, %v1073_v23  ;;  %v1161_v27 = vsub.f32 %v1012_v22, %v1073_v23  ;;  %v3551_v28 = vpop.f32.mrb[2].mxu0 }
 0x19e   : > { %v1169_v29 = vand.u32 4294901760, %v1168_v25  ;;  %v1584_v30 = vand.u32 4294901760, %v3551_v28  ;;  %v1024_v31 = vpop.f32.mrb[3].mxu0 }
 0x19f   : > { %v1162_v32 = vand.u32 4294901760, %v1161_v27  ;;  %v1581_v33 = vand.u32 4294901760, %v1024_v31  ;;  %3751 = vmatprep.subr.bf16.mxu1 %v4509_v26  ;;  %v3758_v35 = vpack.c.bf16 %v1168_v25, %v1161_v27 }
 0x1a0   : > { %v1170_v36 = vsub.f32 %v1168_v25, %v1169_v29  ;;  %v1676_v37 = vsub.f32 %v3551_v28, %v1584_v30  ;;  %3753 = vmatpush3.bf16.msra.mxu1 %v4509_v26 }
 0x1a1   : > { %v1163_v38 = vsub.f32 %v1161_v27, %v1162_v32  ;;  %v4513_v39 = vpack.c.bf16 %v1584_v30, %v1581_v33  ;;  %v1669_v40 = vsub.f32 %v1024_v31, %v1581_v33  ;;  %v3554_v41 = vpop.f32.mrb[4].mxu0  ;;  %v4515_v42 = vpack.c.bf16 %v1169_v29, %v1162_v32  ;;  %v1060_v29 = vld [vmem:[#allocation6 + $0x10] sm:$0xff]  ;;  %v1061_v31 = vld [vmem:[#allocation6 + $0x18] sm:$0xff] }
 0x1a2   : > { %v1677_v43 = vand.u32 4294901760, %v1676_v37  ;;  %v2092_v44 = vand.u32 4294901760, %v3554_v41  ;;  %v1036_v45 = vpop.f32.mrb[5].mxu0  ;;  %v1171_v46 = vand.u32 4294901760, %v1170_v36  ;;  %v1575_v30 = vsel %vm273_vm0, %v1060_v29, 0 }
 0x1a3   : > { %v1670_v47 = vand.u32 4294901760, %v1669_v40  ;;  %v2089_v48 = vand.u32 4294901760, %v1036_v45  ;;  %3563 = vmatmul.mubr.f32.vlgmr.msra.gmra.mrb[0].mxu1 %v1153_v34  ;;  %v1164_v49 = vand.u32 4294901760, %v1163_v38  ;;  %v4517_v50 = vpack.c.bf16 %v1676_v37, %v1669_v40 }
 0x1a4   : > { %v1678_v51 = vsub.f32 %v1676_v37, %v1677_v43  ;;  %v2184_v52 = vsub.f32 %v3554_v41, %v2092_v44  ;;  %3569 = vmatprep.mubr.f32.mxu1 %v4490_v11  ;;  %v1647_v32 = vand.u32 4294901760, %v1575_v30  ;;  %v1578_v33 = vsel %vm273_vm0, %v1061_v31, 0 }
 0x1a5   : > { %v1671_v53 = vsub.f32 %v1669_v40, %v1670_v47  ;;  %v4520_v54 = vpack.c.bf16 %v2092_v44, %v2089_v48  ;;  %v2177_v55 = vsub.f32 %v1036_v45, %v2089_v48  ;;  %v3557_v56 = vpop.f32.mrb[6].mxu0  ;;  %v3754_v57 = vpack.c.bf16 %v1171_v46, %v1164_v49 }
 0x1a6   : > { %v2185_v58 = vand.u32 4294901760, %v2184_v52  ;;  %v2600_v59 = vand.u32 4294901760, %v3557_v56  ;;  %v1048_v60 = vpop.f32.mrb[7].mxu0  ;;  %v1679_v61 = vand.u32 4294901760, %v1678_v51  ;;  %v4522_v62 = vpack.c.bf16 %v1677_v43, %v1670_v47 }
 0x1a7   : > { %v2178_v63 = vand.u32 4294901760, %v2177_v55  ;;  %v2597_v0 = vand.u32 4294901760, %v1048_v60  ;;  %3755 = vmatprep.subr.bf16.mxu1 %v3754_v57  ;;  %v1672_v1 = vand.u32 4294901760, %v1671_v53  ;;  %v4524_v2 = vpack.c.bf16 %v2184_v52, %v2177_v55 }
 0x1a8   : > { %v2186_v3 = vsub.f32 %v2184_v52, %v2185_v58  ;;  %v2692_v4 = vsub.f32 %v3557_v56, %v2600_v59  ;;  %3757 = vmatpush3.bf16.msra.mxu1 %v3754_v57  ;;  %v1657_v34 = vand.u32 4294901760, %v1578_v33  ;;  %v1065_v52 = vld [vmem:[#allocation6 + $0x38] sm:$0xff] }
 0x1a9   : > { %v2179_v5 = vsub.f32 %v2177_v55, %v2178_v63  ;;  %v4526_v6 = vpack.c.bf16 %v2600_v59, %v2597_v0  ;;  %v2685_v7 = vsub.f32 %v1048_v60, %v2597_v0  ;;  %3759 = vmatprep.subr.bf16.mxu1 %v3758_v35  ;;  %v3778_v8 = vpack.c.bf16 %v1679_v61, %v1672_v1 }
 0x1aa   : > { %v2693_v10 = vand.u32 4294901760, %v2692_v4  ;;  %v2187_v13 = vand.u32 4294901760, %v2186_v3  ;;  %v4528_v14 = vpack.c.bf16 %v2185_v58, %v2178_v63  ;;  %v2594_v55 = vsel %vm273_vm0, %v1065_v52, 0 }
 0x1ab   : > { %v2686_v15 = vand.u32 4294901760, %v2685_v7  ;;  %3570 = vmatmul.mubr.f32.vlgmr.msra.gmra.mrb[0].mxu1 %v4500_v17  ;;  %v2180_v16 = vand.u32 4294901760, %v2179_v5  ;;  %v4531_v20 = vpack.c.bf16 %v2692_v4, %v2685_v7  ;;  %v2673_v56 = vand.u32 4294901760, %v2594_v55 }
 0x1ac   : > { %v2694_v21 = vsub.f32 %v2692_v4, %v2693_v10  ;;  %3761 = vmatpush3.bf16.msra.mxu1 %v3758_v35  ;;  %3576 = vmatprep.mubr.f32.mxu1 %v4493_v9  ;;  %v1648_v35 = vsub.f32 %v1575_v30, %v1647_v32  ;;  %v1658_v9 = vsub.f32 %v1578_v33, %v1657_v34 }
 0x1ad   : > { %v2687_v22 = vsub.f32 %v2685_v7, %v2686_v15  ;;  %3763 = vmatprep.subr.bf16.mxu1 %v4509_v26  ;;  %v4535_v23 = vpack.c.bf16 %v2187_v13, %v2180_v16  ;;  %v4537_v24 = vpack.c.bf16 %v2693_v10, %v2686_v15  ;;  %v2674_v58 = vsub.f32 %v2594_v55, %v2673_v56 }
 0x1ae   : > { %v2695_v25 = vand.u32 4294901760, %v2694_v21  ;;  %v1659_v36 = vand.u32 4294901760, %v1658_v9 }
 0x1af   : > { %v2688_v27 = vand.u32 4294901760, %v2687_v22  ;;  %v2675_v60 = vand.u32 4294901760, %v2674_v58 }
 0x1b1   : > { %v4539_v28 = vpack.c.bf16 %v2695_v25, %v2688_v27 }
 0x1b3   : > { %3577 = vmatmul.mubr.f32.vlgmr.msra.gmra.mrb[0].mxu1 %v4503_v18  ;;  %v1660_v18 = vsub.f32 %v1658_v9, %v1659_v36 }
 0x1b4   : > { %3765 = vmatpush3.bf16.msra.mxu1 %v4509_v26  ;;  %3583 = vmatprep.mubr.f32.mxu1 %v1141_v12  ;;  %v1649_v12 = vand.u32 4294901760, %v1648_v35 }
 0x1b5   : > { %3767 = vmatprep.subr.bf16.mxu1 %v4515_v42  ;;  %v1661_v38 = vand.u32 4294901760, %v1660_v18 }
 0x1b6   : > { %v1650_v37 = vsub.f32 %v1648_v35, %v1649_v12 }
 0x1bb   : > { %3584 = vmatmul.mubr.f32.vlgmr.msra.gmra.mrb[0].mxu1 %v1151_v19  ;;  %v1651_v19 = vand.u32 4294901760, %v1650_v37 }
 0x1bc   : > { %3769 = vmatpush3.bf16.msra.mxu1 %v4515_v42  ;;  %3590 = vmatprep.mubr.f32.mxu1 %v4490_v11 }
 0x1bd   : > { %3771 = vmatprep.subr.bf16.mxu1 %v4509_v26 }
 0x1c3   : > { %3591 = vmatmul.mubr.f32.vlgmr.msra.gmra.mrb[0].mxu1 %v4500_v17 }
 0x1c4   : > { %3773 = vmatpush3.bf16.msra.mxu1 %v4509_v26  ;;  %3597 = vmatprep.mubr.f32.mxu1 %v4490_v11  ;;  %v1062_v11 = vld [vmem:[#allocation6 + $0x20] sm:$0xff]  ;;  %v1063_v26 = vld [vmem:[#allocation6 + $0x28] sm:$0xff] }
 0x1c5   : > { %3775 = vmatprep.subr.bf16.mxu1 %v4513_v39  ;;  %v2086_v41 = vsel %vm273_vm0, %v1063_v26, 0 }
 0x1c6   : > { %v2165_v42 = vand.u32 4294901760, %v2086_v41 }
 0x1c8   : > { %v2166_v44 = vsub.f32 %v2086_v41, %v2165_v42 }
 0x1ca   : > { %v2167_v46 = vand.u32 4294901760, %v2166_v44 }
 0x1cb   : > { %3598 = vmatmul.mubr.f32.vlgmr.msra.gmra.mrb[0].mxu1 %v4500_v17  ;;  %v2083_v17 = vsel %vm273_vm0, %v1062_v11, 0 }
 0x1cc   : > { %3777 = vmatpush3.bf16.msra.mxu1 %v4513_v39  ;;  %3604 = vmatprep.mubr.f32.mxu1 %v1651_v19  ;;  %v2155_v40 = vand.u32 4294901760, %v2083_v17  ;;  %v2168_v48 = vsub.f32 %v2166_v44, %v2167_v46 }
 0x1cd   : > { %3779 = vmatprep.subr.bf16.mxu1 %v3778_v8 }
 0x1ce   : > { %v2156_v43 = vsub.f32 %v2083_v17, %v2155_v40 }
 0x1cf   : > { %3605 = vmatmul.mubr.f32.vlgmr.msra.gmra.mrb[2].mxu1 %v1661_v38 }
 0x1d0   : > { %3781 = vmatpush3.bf16.msra.mxu1 %v3778_v8  ;;  %3611 = vmatprep.mubr.f32.mxu1 %v1647_v32  ;;  %v2157_v45 = vand.u32 4294901760, %v2156_v43 }
 0x1d1   : > { %3783 = vmatprep.subr.bf16.mxu1 %v4517_v50 }
 0x1d2   : > { %v2158_v47 = vsub.f32 %v2156_v43, %v2157_v45 }
 0x1d4   : > { %v2159_v49 = vand.u32 4294901760, %v2158_v47 }
 0x1d7   : > { %3612 = vmatmul.mubr.f32.vlgmr.msra.gmra.mrb[2].mxu1 %v1657_v34 }
 0x1d8   : > { %3785 = vmatpush3.bf16.msra.mxu1 %v4517_v50  ;;  %3618 = vmatprep.mubr.f32.mxu1 %v1648_v35  ;;  %v2169_v50 = vand.u32 4294901760, %v2168_v48 }
 0x1d9   : > { %3787 = vmatprep.subr.bf16.mxu1 %v4513_v39 }
 0x1df   : > { %3619 = vmatmul.mubr.f32.vlgmr.msra.gmra.mrb[2].mxu1 %v1658_v9 }
 0x1e0   : > { %3789 = vmatpush3.bf16.msra.mxu1 %v4513_v39  ;;  %3625 = vmatprep.mubr.f32.mxu1 %v1649_v12 }
 0x1e1   : > { %3791 = vmatprep.subr.bf16.mxu1 %v4522_v62 }
 0x1e7   : > { %3626 = vmatmul.mubr.f32.vlgmr.msra.gmra.mrb[2].mxu1 %v1659_v36 }
 0x1e8   : > { %3793 = vmatpush3.bf16.msra.mxu1 %v4522_v62  ;;  %3632 = vmatprep.mubr.f32.mxu1 %v1647_v32  ;;  %v2676_v62 = vsub.f32 %v2674_v58, %v2675_v60 }
 0x1e9   : > { %3795 = vmatprep.subr.bf16.mxu1 %v4513_v39 }
 0x1ea   : > { %v2677_v0 = vand.u32 4294901760, %v2676_v62 }
 0x1ef   : > { %3633 = vmatmul.mubr.f32.vlgmr.msra.gmra.mrb[2].mxu1 %v1657_v34 }
 0x1f0   : > { %3797 = vmatpush3.bf16.msra.mxu1 %v4513_v39  ;;  %3639 = vmatprep.mubr.f32.mxu1 %v1647_v32  ;;  %v1064_v39 = vld [vmem:[#allocation6 + $0x30] sm:$0xff] }
 0x1f1   : > { %3799 = vmatprep.subr.bf16.mxu1 %v4520_v54  ;;  %v2591_v51 = vsel %vm273_vm0, %v1064_v39, 0 }
 0x1f2   : > { %v2663_v53 = vand.u32 4294901760, %v2591_v51 }
 0x1f4   : > { %v2664_v57 = vsub.f32 %v2591_v51, %v2663_v53 }
 0x1f6   : > { %v2665_v59 = vand.u32 4294901760, %v2664_v57 }
 0x1f7   : > { %3640 = vmatmul.mubr.f32.vlgmr.msra.gmra.mrb[2].mxu1 %v1657_v34 }
 0x1f8   : > { %3801 = vmatpush3.bf16.msra.mxu1 %v4520_v54  ;;  %3646 = vmatprep.mubr.f32.mxu1 %v2159_v49  ;;  %v2666_v61 = vsub.f32 %v2664_v57, %v2665_v59 }
 0x1f9   : > { %3803 = vmatprep.subr.bf16.mxu1 %v4535_v23 }
 0x1fa   : > { %v2667_v63 = vand.u32 4294901760, %v2666_v61 }
 0x1fb   : > { %3647 = vmatmul.mubr.f32.vlgmr.msra.gmra.mrb[4].mxu1 %v2169_v50 }
 0x1fc   : > { %3805 = vmatpush3.bf16.msra.mxu1 %v4535_v23  ;;  %3653 = vmatprep.mubr.f32.mxu1 %v2155_v40 }
 0x1fd   : > { %3807 = vmatprep.subr.bf16.mxu1 %v4524_v2 }
 0x203   : > { %3654 = vmatmul.mubr.f32.vlgmr.msra.gmra.mrb[4].mxu1 %v2165_v42 }
 0x204   : > { %3809 = vmatpush3.bf16.msra.mxu1 %v4524_v2  ;;  %3660 = vmatprep.mubr.f32.mxu1 %v2156_v43 }
 0x205   : > { %3811 = vmatprep.subr.bf16.mxu1 %v4520_v54 }
 0x20b   : > { %3661 = vmatmul.mubr.f32.vlgmr.msra.gmra.mrb[4].mxu1 %v2166_v44 }
 0x20c   : > { %3813 = vmatpush3.bf16.msra.mxu1 %v4520_v54  ;;  %3667 = vmatprep.mubr.f32.mxu1 %v2157_v45 }
 0x20d   : > { %3815 = vmatprep.subr.bf16.mxu1 %v4528_v14 }
 0x213   : > { %3668 = vmatmul.mubr.f32.vlgmr.msra.gmra.mrb[4].mxu1 %v2167_v46 }
 0x214   : > { %3817 = vmatpush3.bf16.msra.mxu1 %v4528_v14  ;;  %3674 = vmatprep.mubr.f32.mxu1 %v2155_v40 }
 0x215   : > { %3819 = vmatprep.subr.bf16.mxu1 %v4520_v54 }
 0x21b   : > { %3675 = vmatmul.mubr.f32.vlgmr.msra.gmra.mrb[4].mxu1 %v2165_v42 }
 0x21c   : > { %3821 = vmatpush3.bf16.msra.mxu1 %v4520_v54  ;;  %3681 = vmatprep.mubr.f32.mxu1 %v2155_v40 }
 0x21d   : > { %3823 = vmatprep.subr.bf16.mxu1 %v4526_v6 }
 0x223   : > { %3682 = vmatmul.mubr.f32.vlgmr.msra.gmra.mrb[4].mxu1 %v2165_v42 }
 0x224   : > { %3825 = vmatpush3.bf16.msra.mxu1 %v4526_v6  ;;  %3688 = vmatprep.mubr.f32.mxu1 %v2667_v63 }
 0x225   : > { %3827 = vmatprep.subr.bf16.mxu1 %v4539_v28 }
 0x227   : > { %3689 = vmatmul.mubr.f32.vlgmr.msra.gmra.mrb[6].mxu1 %v2677_v0 }
 0x228   : > { %3829 = vmatpush3.bf16.msra.mxu1 %v4539_v28  ;;  %3695 = vmatprep.mubr.f32.mxu1 %v2663_v53 }
 0x229   : > { %3831 = vmatprep.subr.bf16.mxu1 %v4531_v20 }
 0x22f   : > { %3696 = vmatmul.mubr.f32.vlgmr.msra.gmra.mrb[6].mxu1 %v2673_v56 }
 0x230   : > { %3833 = vmatpush3.bf16.msra.mxu1 %v4531_v20  ;;  %3702 = vmatprep.mubr.f32.mxu1 %v2664_v57 }
 0x231   : > { %3835 = vmatprep.subr.bf16.mxu1 %v4526_v6 }
 0x237   : > { %3703 = vmatmul.mubr.f32.vlgmr.msra.gmra.mrb[6].mxu1 %v2674_v58 }
 0x238   : > { %3837 = vmatpush3.bf16.msra.mxu1 %v4526_v6  ;;  %3709 = vmatprep.mubr.f32.mxu1 %v2665_v59 }
 0x239   : > { %3839 = vmatprep.subr.bf16.mxu1 %v4537_v24 }
 0x23f   : > { %3710 = vmatmul.mubr.f32.vlgmr.msra.gmra.mrb[6].mxu1 %v2675_v60 }
 0x240   : > { %3841 = vmatpush3.bf16.msra.mxu1 %v4537_v24  ;;  %3716 = vmatprep.mubr.f32.mxu1 %v2663_v53 }
 0x241   : > { %3843 = vmatprep.subr.bf16.mxu1 %v4526_v6 }
 0x247   : > { %3717 = vmatmul.mubr.f32.vlgmr.msra.gmra.mrb[6].mxu1 %v2673_v56 }
 0x248   : > { %3845 = vmatpush3.bf16.msra.mxu1 %v4526_v6  ;;  %3723 = vmatprep.mubr.f32.mxu1 %v2663_v53 }
 0x24f   : > { %3724 = vmatmul.mubr.f32.vlgmr.msra.gmra.mrb[6].mxu1 %v2673_v56 }
 0x29e   : > { %v3599_v54 = vpop.f32.mrb[0].mxu1 }
 0x29f   : > { %3294 = vst.msk [vmem:[%s4600_s8 + $0x40] sm:$0xff] %vm3098_vm1, %v3599_v54  ;;  %3133 = vrot.lane.b32.xlu0 %v3599_v54, %s4152_s9  ;;  %v1564_v1 = vpop.f32.mrb[1].mxu1 }
 0x2a0   : > { %3099 = vst.msk [vmem:[%s4600_s8] sm:$0xff] %vm3098_vm1, %v1564_v1 }
 0x2a3   : > { %3107 = vrot.lane.b32.xlu0 %v1564_v1, %s4152_s9 }
 0x2ca   : > { %v3641_v2 = vpop.f32.mrb[2].mxu1 }
 0x2cb   : > { %3295 = vst.msk [vmem:[%s4600_s8 + $0x48] sm:$0xff] %vm3098_vm1, %v3641_v2  ;;  %3135 = vrot.lane.b32.xlu1 %v3641_v2, %s4152_s9  ;;  %v2072_v3 = vpop.f32.mrb[3].mxu1 }
 0x2cc   : > { %3100 = vst.msk [vmem:[%s4600_s8 + $0x8] sm:$0xff] %vm3098_vm1, %v2072_v3  ;;  %3109 = vrot.lane.b32.xlu0 %v2072_v3, %s4152_s9 }
 0x2f6   : > { %v3683_v4 = vpop.f32.mrb[4].mxu1 }
 0x2f7   : > { %3296 = vst.msk [vmem:[%s4600_s8 + $0x50] sm:$0xff] %vm3098_vm1, %v3683_v4  ;;  %3137 = vrot.lane.b32.xlu0 %v3683_v4, %s4152_s9  ;;  %v2580_v5 = vpop.f32.mrb[5].mxu1 }
 0x2f8   : > { %3101 = vst.msk [vmem:[%s4600_s8 + $0x10] sm:$0xff] %vm3098_vm1, %v2580_v5  ;;  %3111 = vrot.lane.b32.xlu1 %v2580_v5, %s4152_s9 }
 0x311   : > { %v3134_v6 = vpop.permute.xlu0 %3133 }
 0x312   : > { %3298 = vst.msk [vmem:[%s4600_s8 + $0x60] sm:$0xff] %vm3098_vm1, %v3134_v6 }
 0x315   : > { %v3108_v7 = vpop.permute.xlu0 %3107 }
 0x316   : > { %3290 = vst.msk [vmem:[%s4600_s8 + $0x20] sm:$0xff] %vm3098_vm1, %v3108_v7 }
 0x322   : > { %v3725_v8 = vpop.f32.mrb[6].mxu1 }
 0x323   : > { %3297 = vst.msk [vmem:[%s4600_s8 + $0x58] sm:$0xff] %vm3098_vm1, %v3725_v8  ;;  %v3088_v10 = vpop.f32.mrb[7].mxu1 }
 0x324   : > { %3102 = vst.msk [vmem:[%s4600_s8 + $0x18] sm:$0xff] %vm3098_vm1, %v3088_v10  ;;  %3113 = vrot.lane.b32.xlu1 %v3088_v10, %s4152_s9 }
 0x328   : > { %3139 = vrot.lane.b32.xlu1 %v3725_v8, %s4152_s9 }
 0x33d   : > { %v3136_v13 = vpop.permute.xlu1 %3135 }
 0x33e   : > { %3299 = vst.msk [vmem:[%s4600_s8 + $0x68] sm:$0xff] %vm3098_vm1, %v3136_v13  ;;  %v3110_v14 = vpop.permute.xlu0 %3109 }
 0x33f   : > { %3291 = vst.msk [vmem:[%s4600_s8 + $0x28] sm:$0xff] %vm3098_vm1, %v3110_v14 }
 0x369   : > { %v3138_v15 = vpop.permute.xlu0 %3137 }
 0x36a   : > { %3300 = vst.msk [vmem:[%s4600_s8 + $0x70] sm:$0xff] %vm3098_vm1, %v3138_v15  ;;  %v3112_v16 = vpop.permute.xlu1 %3111 }
 0x36b   : > { %3292 = vst.msk [vmem:[%s4600_s8 + $0x30] sm:$0xff] %vm3098_vm1, %v3112_v16 }
 0x396   : > { %v3114_v20 = vpop.permute.xlu1 %3113 }
 0x397   : > { %3293 = vst.msk [vmem:[%s4600_s8 + $0x38] sm:$0xff] %vm3098_vm1, %v3114_v20 }
 0x39a   : > { %v3140_v21 = vpop.permute.xlu1 %3139 }
 0x39b   : > { %3301 = vst.msk [vmem:[%s4600_s8 + $0x78] sm:$0xff] %vm3098_vm1, %v3140_v21 }
 0x39c PF: > { %s17_s17 = sadd.s32 1, %s4145_s17   ;;  %s4668_s15 = smov %s4295_s12 }
 0x39d   : > { %p14_p9 = scmp.ge.s32.totalorder %s17_s17, 4   ;;  %s4669_s12 = smov %s4129_s13 }
 0x39e   : > { %s4670_s13 = smov %s4133_s14  ;;  %s4671_s14 = smov %s4668_s15 }
 0x39f   : > { %s4672_s15 = smov %s4141_s16  ;;  %s4673_s16 = smov %s4675_s5 }
 0x3a0   :  { %16 = sbr.rel (!%p14_p9) target bundleno = 5 (0x5), region = 83 }
 0x3a7   :  { %3183 = vsyncpa [#allocation3], 1 }
 0x3a8   :  { %3185 = vsyncpa [#allocation3 + $0x1], 1 }
 0x3a9   :  { %3186 = vsyncpa [#allocation5], 1 }

</bundles_post_ra>
